<compile_context>
chip_gen: v7x
topology: tpu7x:2x2x1
jax: 0.10.0
libtpu: 0.0.40
codegen_flags: <defaults>
</compile_context>

<pallas_src>
import functools
import math

import jax
import jax.numpy as jnp
from jax.experimental import pallas as pl
from jax.experimental.pallas import tpu as pltpu


def _round_up(x, m):
    return ((x + m - 1) // m) * m


def _cdiv(a, b):
    return (a + b - 1) // b


def _tile_vmem_bytes(rows, cols, dtype):
    """VMEM footprint of a [rows, cols] block including (sublane, lane) layout padding."""
    item = jnp.dtype(dtype).itemsize
    sublane = 8 * max(1, 4 // item)          # 8 for f32, 16 for bf16
    return _round_up(max(rows, 1), sublane) * _round_up(max(cols, 1), 128) * item


def _pad2d(a, rows, cols):
    pr, pc = rows - a.shape[0], cols - a.shape[1]
    if pr == 0 and pc == 0:
        return a
    return jnp.pad(a, ((0, pr), (0, pc)))


def actor_kernel(x_ref, w1_ref, b1_ref, w2_ref, b2_ref, w3_ref, b3_ref, o_ref,
                 *, max_action):
    # Cast the streamed x tile to the weight dtype in-register (no wrapper HBM round trip).
    x = x_ref[...].astype(w1_ref.dtype)
    # Layer 1: Linear + ReLU (MXU matmul with f32 accumulation; bias/ReLU in f32 on VPU).
    h1 = jnp.dot(x, w1_ref[...], preferred_element_type=jnp.float32)
    h1 = jnp.maximum(h1 + b1_ref[...], 0.0)
    # Layer 2: Linear + ReLU (only the matmul operand drops to the weight dtype).
    h2 = jnp.dot(h1.astype(w2_ref.dtype), w2_ref[...], preferred_element_type=jnp.float32)
    h2 = jnp.maximum(h2 + b2_ref[...], 0.0)
    # Layer 3: Linear + tanh (EUP), scaled by the baked-in max_action immediate.
    h3 = jnp.dot(h2.astype(w3_ref.dtype), w3_ref[...], preferred_element_type=jnp.float32)
    h3 = h3 + b3_ref[...]
    o_ref[...] = (max_action * jnp.tanh(h3)).astype(o_ref.dtype)


def actor_forward(x, params, max_action, *, block_batch=1024):
    """x: [B, state_dim] float32. Returns [B, action_dim] float32."""
    w1, b1, w2, b2, w3, b3 = params
    B, state_dim = x.shape
    hidden = w1.shape[1]
    action_dim = w3.shape[1]
    w_dtype = w1.dtype
    out_dtype = w_dtype            # bf16 weights => bf16 writeback (halves output HBM traffic)

    # --- Lane-dense layers: pad hidden and action_dim up to multiples of 128. ---
    h_pad = _round_up(hidden, 128)
    n_pad = _round_up(action_dim, 128)
    w1p = _pad2d(w1, state_dim, h_pad)
    b1p = _pad2d(b1, 1, h_pad)
    w2p = _pad2d(w2, h_pad, h_pad)
    b2p = _pad2d(b2, 1, h_pad)
    w3p = _pad2d(w3, h_pad, n_pad)
    b3p = _pad2d(b3, 1, n_pad)

    # --- Batch tile: minimize last-tile padding waste; for large batches force >=2 grid
    #     steps so ("parallel",) can shard across v7x's two TensorCores. ---
    num_tiles = _cdiv(B, block_batch)
    if B >= 1024:
        num_tiles = max(num_tiles, 2)
    tb = _round_up(_cdiv(B, num_tiles), 16)          # 16 sublanes: safe for f32 and bf16

    # --- Layout-aware VMEM budget; shrink tb if it would exceed the per-chip cap. ---
    try:
        phys = int(pltpu.get_tpu_info().vmem_capacity_bytes)
    except Exception:
        phys = 64 << 20                               # conservative (v7x-sized) fallback
    cap = max(32 << 20, int(phys * 0.85))             # leave Mosaic headroom below physical

    def _budget(tb_, weight_bufs):
        b = 2 * _tile_vmem_bytes(tb_, state_dim, x.dtype)        # x: double-buffered
        b += 2 * _tile_vmem_bytes(tb_, n_pad, out_dtype)         # out: double-buffered
        wb = (_tile_vmem_bytes(state_dim, h_pad, w_dtype)        # resident weights
              + _tile_vmem_bytes(h_pad, h_pad, w_dtype)
              + _tile_vmem_bytes(h_pad, n_pad, w_dtype)
              + 2 * _tile_vmem_bytes(1, h_pad, jnp.float32)      # resident biases (f32)
              + _tile_vmem_bytes(1, n_pad, jnp.float32))
        b += weight_bufs * wb
        b += 4 * _round_up(tb_, 8) * h_pad * 4                   # f32 h1/h2 + operand copies
        return b + (4 << 20)                                     # internal scratch headroom

    while _budget(tb, 1) > cap and tb > 16:
        tb = max(16, _round_up(tb // 2, 16))

    b_pad = _round_up(B, tb)
    xp = x if b_pad == B else jnp.pad(x, ((0, b_pad - B), (0, 0)))
    grid = (b_pad // tb,)

    item_w = jnp.dtype(w_dtype).itemsize
    w_elems = state_dim * h_pad + h_pad * h_pad + h_pad * n_pad
    cost = pl.CostEstimate(
        flops=int(2 * b_pad * w_elems),
        transcendentals=int(b_pad * n_pad),
        bytes_accessed=int(b_pad * state_dim * jnp.dtype(x.dtype).itemsize
                           + w_elems * item_w
                           + (2 * h_pad + n_pad) * 4
                           + b_pad * n_pad * jnp.dtype(out_dtype).itemsize),
    )

    const2 = lambda i: (0, 0)

    def _run(single_buffer_weights):
        if single_buffer_weights:
            res = lambda shape: pl.BlockSpec(shape, const2, pipeline_mode=pl.Buffered(1))
        else:
            res = lambda shape: pl.BlockSpec(shape, const2)
        budget = int(min(max(_budget(tb, 1 if single_buffer_weights else 2), 16 << 20), cap))
        return pl.pallas_call(
            functools.partial(actor_kernel, max_action=float(max_action)),
            out_shape=jax.ShapeDtypeStruct((b_pad, n_pad), out_dtype),
            grid=grid,
            in_specs=[
                pl.BlockSpec((tb, state_dim), lambda i: (i, 0)),   # x: tiled over batch
                res((state_dim, h_pad)),                           # weights/biases: resident
                res((1, h_pad)),
                res((h_pad, h_pad)),
                res((1, h_pad)),
                res((h_pad, n_pad)),
                res((1, n_pad)),
            ],
            out_specs=pl.BlockSpec((tb, n_pad), lambda i: (i, 0)),
            compiler_params=pltpu.CompilerParams(
                dimension_semantics=("parallel",),                 # both TCs on v7x
                vmem_limit_bytes=budget,
            ),
            cost_estimate=cost,
        )(xp, w1p, b1p, w2p, b2p, w3p, b3p)

    # Prefer single-buffered grid-invariant weights (halves their VMEM footprint); fall
    # back to default pipelining if this JAX build rejects pipeline_mode on these specs.
    try:
        out = _run(True)
    except Exception:
        out = _run(False)

    return out[:B, :action_dim].astype(jnp.float32)


def init_params(key, state_dim, action_dim, hidden_size, param_dtype=jnp.float32):
    """Deterministic init; weights stored [in, out] (transposed vs nn.Linear), biases [1, out].

    Weights may be bf16 (matmul operands); biases stay f32 (added to the f32 accumulator).
    """
    ks = jax.random.split(key, 6)

    def lin(kw, kb, fan_in, fan_out):
        bound = 1.0 / math.sqrt(fan_in)
        w = jax.random.uniform(kw, (fan_in, fan_out), jnp.float32, -bound, bound)
        b = jax.random.uniform(kb, (1, fan_out), jnp.float32, -bound, bound)
        return w.astype(param_dtype), b

    w1, b1 = lin(ks[0], ks[1], state_dim, hidden_size)
    w2, b2 = lin(ks[2], ks[3], hidden_size, hidden_size)
    w3, b3 = lin(ks[4], ks[5], hidden_size, action_dim)
    return (w1, b1, w2, b2, w3, b3)


if __name__ == "__main__":
    key = jax.random.PRNGKey(0)
    batch = 2
    state_dim = 8
    action_dim = 4
    hidden_size = 32
    action_bound = [2.0]                 # Actor takes max_action = float(action_bound[0])
    max_action = float(action_bound[0])

    k_in, k_p = jax.random.split(key)
    x = jax.random.normal(k_in, (batch, state_dim), dtype=jnp.float32)

    # ---- f32 path (exact check against plain-JAX reference of the PyTorch forward) ----
    params_f32 = init_params(k_p, state_dim, action_dim, hidden_size, jnp.float32)
    out_f32 = jax.block_until_ready(actor_forward(x, params_f32, max_action))

    w1, b1, w2, b2, w3, b3 = params_f32
    h = jnp.maximum(x @ w1 + b1, 0.0)
    h = jnp.maximum(h @ w2 + b2, 0.0)
    ref = max_action * jnp.tanh(h @ w3 + b3)
    assert out_f32.shape == (batch, action_dim)
    assert jnp.allclose(out_f32, ref, atol=1e-5, rtol=1e-5)

    # ---- bf16-weight path (MXU-native on v5e/v6e/v7x, f32 accumulation); loose tolerance ----
    params_bf16 = init_params(k_p, state_dim, action_dim, hidden_size, jnp.bfloat16)
    out_bf16 = jax.block_until_ready(actor_forward(x, params_bf16, max_action))
    assert out_bf16.shape == (batch, action_dim)
    assert jnp.allclose(out_bf16, ref, atol=5e-2, rtol=5e-2)

    print("KERNEL_OK")
</pallas_src>

<mosaic_0001>
module attributes {stable_mosaic.version = 11 : i64} {
  func.func @actor_kernel(%arg0: i32, %arg1: memref<16x8xf32, #tpu.memory_space<vmem>>, %arg2: memref<8x128xf32, #tpu.memory_space<vmem>>, %arg3: memref<1x128xf32, #tpu.memory_space<vmem>>, %arg4: memref<128x128xf32, #tpu.memory_space<vmem>>, %arg5: memref<1x128xf32, #tpu.memory_space<vmem>>, %arg6: memref<128x128xf32, #tpu.memory_space<vmem>>, %arg7: memref<1x128xf32, #tpu.memory_space<vmem>>, %arg8: memref<16x128xf32, #tpu.memory_space<vmem>>) attributes {dimension_semantics = [#tpu.dimension_semantics<parallel>], iteration_bounds = array<i64: 1>, scalar_prefetch = 0 : i64, scratch_operands = 0 : i64, tpu.core_type = #tpu.core_type<tc>, window_params = [{transform_indices = @transform_0, window_bounds = array<i64: 16, 8>}, {pipeline_mode = #tpu.pipeline_mode<synchronous>, transform_indices = @transform_1, window_bounds = array<i64: 8, 128>}, {pipeline_mode = #tpu.pipeline_mode<synchronous>, transform_indices = @transform_2, window_bounds = array<i64: 1, 128>}, {pipeline_mode = #tpu.pipeline_mode<synchronous>, transform_indices = @transform_3, window_bounds = array<i64: 128, 128>}, {pipeline_mode = #tpu.pipeline_mode<synchronous>, transform_indices = @transform_4, window_bounds = array<i64: 1, 128>}, {pipeline_mode = #tpu.pipeline_mode<synchronous>, transform_indices = @transform_5, window_bounds = array<i64: 128, 128>}, {pipeline_mode = #tpu.pipeline_mode<synchronous>, transform_indices = @transform_6, window_bounds = array<i64: 1, 128>}, {transform_indices = @transform_7, window_bounds = array<i64: 16, 128>}]} {
    %c0 = arith.constant 0 : index
    %c0_0 = arith.constant 0 : index
    %0 = vector.load %arg1[%c0, %c0_0] : memref<16x8xf32, #tpu.memory_space<vmem>>, vector<16x8xf32>
    %c0_1 = arith.constant 0 : index
    %c0_2 = arith.constant 0 : index
    %1 = vector.load %arg2[%c0_1, %c0_2] : memref<8x128xf32, #tpu.memory_space<vmem>>, vector<8x128xf32>
    %cst = arith.constant dense<0.000000e+00> : vector<16x128xf32>
    %2 = tpu.matmul %0, %1, %cst {dimension_numbers = #tpu.dot_dimension_numbers<[1], [0], [0], [1], [0, 0, 1, 1], [], []>} : vector<16x8xf32>, vector<8x128xf32>, vector<16x128xf32> -> vector<16x128xf32>
    %c0_3 = arith.constant 0 : index
    %c0_4 = arith.constant 0 : index
    %3 = vector.load %arg3[%c0_3, %c0_4] : memref<1x128xf32, #tpu.memory_space<vmem>>, vector<1x128xf32>
    %4 = vector.broadcast %3 : vector<1x128xf32> to vector<16x128xf32>
    %5 = arith.addf %2, %4 : vector<16x128xf32>
    %cst_5 = arith.constant 0.000000e+00 : f32
    %6 = vector.broadcast %cst_5 : f32 to vector<16x128xf32>
    %7 = arith.maximumf %5, %6 : vector<16x128xf32>
    %c0_6 = arith.constant 0 : index
    %c0_7 = arith.constant 0 : index
    %8 = vector.load %arg4[%c0_6, %c0_7] : memref<128x128xf32, #tpu.memory_space<vmem>>, vector<128x128xf32>
    %cst_8 = arith.constant dense<0.000000e+00> : vector<16x128xf32>
    %9 = tpu.matmul %7, %8, %cst_8 {dimension_numbers = #tpu.dot_dimension_numbers<[1], [0], [0], [1], [0, 0, 1, 1], [], []>} : vector<16x128xf32>, vector<128x128xf32>, vector<16x128xf32> -> vector<16x128xf32>
    %c0_9 = arith.constant 0 : index
    %c0_10 = arith.constant 0 : index
    %10 = vector.load %arg5[%c0_9, %c0_10] : memref<1x128xf32, #tpu.memory_space<vmem>>, vector<1x128xf32>
    %11 = vector.broadcast %10 : vector<1x128xf32> to vector<16x128xf32>
    %12 = arith.addf %9, %11 : vector<16x128xf32>
    %cst_11 = arith.constant 0.000000e+00 : f32
    %13 = vector.broadcast %cst_11 : f32 to vector<16x128xf32>
    %14 = arith.maximumf %12, %13 : vector<16x128xf32>
    %c0_12 = arith.constant 0 : index
    %c0_13 = arith.constant 0 : index
    %15 = vector.load %arg6[%c0_12, %c0_13] : memref<128x128xf32, #tpu.memory_space<vmem>>, vector<128x128xf32>
    %cst_14 = arith.constant dense<0.000000e+00> : vector<16x128xf32>
    %16 = tpu.matmul %14, %15, %cst_14 {dimension_numbers = #tpu.dot_dimension_numbers<[1], [0], [0], [1], [0, 0, 1, 1], [], []>} : vector<16x128xf32>, vector<128x128xf32>, vector<16x128xf32> -> vector<16x128xf32>
    %c0_15 = arith.constant 0 : index
    %c0_16 = arith.constant 0 : index
    %17 = vector.load %arg7[%c0_15, %c0_16] : memref<1x128xf32, #tpu.memory_space<vmem>>, vector<1x128xf32>
    %18 = vector.broadcast %17 : vector<1x128xf32> to vector<16x128xf32>
    %19 = arith.addf %16, %18 : vector<16x128xf32>
    %20 = math.tanh %19 : vector<16x128xf32>
    %cst_17 = arith.constant 2.000000e+00 : f32
    %21 = vector.broadcast %cst_17 : f32 to vector<16x128xf32>
    %22 = arith.mulf %21, %20 : vector<16x128xf32>
    %c0_18 = arith.constant 0 : index
    %c0_19 = arith.constant 0 : index
    %23 = vector.load %arg8[%c0_18, %c0_19] : memref<16x128xf32, #tpu.memory_space<vmem>>, vector<16x128xf32>
    tpu.vector_store %arg8[%c0_18, %c0_19], %22 {strides = array<i32>} : memref<16x128xf32, #tpu.memory_space<vmem>>, vector<16x128xf32>,
    return
  }
  func.func @transform_0(%arg0: i32) -> (i32, i32) {
    %c0_i32 = arith.constant 0 : i32
    %c0_i32_0 = arith.constant 0 : i32
    return %arg0, %c0_i32 : i32, i32
  }
  func.func @transform_1(%arg0: i32) -> (i32, i32) {
    %c0_i32 = arith.constant 0 : i32
    %c0_i32_0 = arith.constant 0 : i32
    %c0_i32_1 = arith.constant 0 : i32
    return %c0_i32, %c0_i32_0 : i32, i32
  }
  func.func @transform_2(%arg0: i32) -> (i32, i32) {
    %c0_i32 = arith.constant 0 : i32
    %c0_i32_0 = arith.constant 0 : i32
    %c0_i32_1 = arith.constant 0 : i32
    return %c0_i32, %c0_i32_0 : i32, i32
  }
  func.func @transform_3(%arg0: i32) -> (i32, i32) {
    %c0_i32 = arith.constant 0 : i32
    %c0_i32_0 = arith.constant 0 : i32
    %c0_i32_1 = arith.constant 0 : i32
    return %c0_i32, %c0_i32_0 : i32, i32
  }
  func.func @transform_4(%arg0: i32) -> (i32, i32) {
    %c0_i32 = arith.constant 0 : i32
    %c0_i32_0 = arith.constant 0 : i32
    %c0_i32_1 = arith.constant 0 : i32
    return %c0_i32, %c0_i32_0 : i32, i32
  }
  func.func @transform_5(%arg0: i32) -> (i32, i32) {
    %c0_i32 = arith.constant 0 : i32
    %c0_i32_0 = arith.constant 0 : i32
    %c0_i32_1 = arith.constant 0 : i32
    return %c0_i32, %c0_i32_0 : i32, i32
  }
  func.func @transform_6(%arg0: i32) -> (i32, i32) {
    %c0_i32 = arith.constant 0 : i32
    %c0_i32_0 = arith.constant 0 : i32
    %c0_i32_1 = arith.constant 0 : i32
    return %c0_i32, %c0_i32_0 : i32, i32
  }
  func.func @transform_7(%arg0: i32) -> (i32, i32) {
    %c0_i32 = arith.constant 0 : i32
    %c0_i32_0 = arith.constant 0 : i32
    return %arg0, %c0_i32 : i32, i32
  }
}

module attributes {stable_mosaic.version = 11 : i64} {
  func.func @actor_kernel(%arg0: i32, %arg1: memref<16x8xf32, #tpu.memory_space<vmem>>, %arg2: memref<8x128xf32, #tpu.memory_space<vmem>>, %arg3: memref<1x128xf32, #tpu.memory_space<vmem>>, %arg4: memref<128x128xf32, #tpu.memory_space<vmem>>, %arg5: memref<1x128xf32, #tpu.memory_space<vmem>>, %arg6: memref<128x128xf32, #tpu.memory_space<vmem>>, %arg7: memref<1x128xf32, #tpu.memory_space<vmem>>, %arg8: memref<16x128xf32, #tpu.memory_space<vmem>>) attributes {dimension_semantics = [#tpu.dimension_semantics<parallel>], iteration_bounds = array<i64: 1>, scalar_prefetch = 0 : i64, scratch_operands = 0 : i64, tpu.core_type = #tpu.core_type<tc>, window_params = [{transform_indices = @transform_0, window_bounds = array<i64: 16, 8>}, {pipeline_mode = #tpu.pipeline_mode<synchronous>, transform_indices = @transform_1, window_bounds = array<i64: 8, 128>}, {pipeline_mode = #tpu.pipeline_mode<synchronous>, transform_indices = @transform_2, window_bounds = array<i64: 1, 128>}, {pipeline_mode = #tpu.pipeline_mode<synchronous>, transform_indices = @transform_3, window_bounds = array<i64: 128, 128>}, {pipeline_mode = #tpu.pipeline_mode<synchronous>, transform_indices = @transform_4, window_bounds = array<i64: 1, 128>}, {pipeline_mode = #tpu.pipeline_mode<synchronous>, transform_indices = @transform_5, window_bounds = array<i64: 128, 128>}, {pipeline_mode = #tpu.pipeline_mode<synchronous>, transform_indices = @transform_6, window_bounds = array<i64: 1, 128>}, {transform_indices = @transform_7, window_bounds = array<i64: 16, 128>}]} {
    %c0 = arith.constant 0 : index
    %c0_0 = arith.constant 0 : index
    %0 = vector.load %arg1[%c0, %c0_0] : memref<16x8xf32, #tpu.memory_space<vmem>>, vector<16x8xf32>
    %c0_1 = arith.constant 0 : index
    %c0_2 = arith.constant 0 : index
    %1 = vector.load %arg2[%c0_1, %c0_2] : memref<8x128xf32, #tpu.memory_space<vmem>>, vector<8x128xf32>
    %cst = arith.constant dense<0.000000e+00> : vector<16x128xf32>
    %2 = tpu.matmul %0, %1, %cst {dimension_numbers = #tpu.dot_dimension_numbers<[1], [0], [0], [1], [0, 0, 1, 1], [], []>} : vector<16x8xf32>, vector<8x128xf32>, vector<16x128xf32> -> vector<16x128xf32>
    %c0_3 = arith.constant 0 : index
    %c0_4 = arith.constant 0 : index
    %3 = vector.load %arg3[%c0_3, %c0_4] : memref<1x128xf32, #tpu.memory_space<vmem>>, vector<1x128xf32>
    %4 = vector.broadcast %3 : vector<1x128xf32> to vector<16x128xf32>
    %5 = arith.addf %2, %4 : vector<16x128xf32>
    %cst_5 = arith.constant 0.000000e+00 : f32
    %6 = vector.broadcast %cst_5 : f32 to vector<16x128xf32>
    %7 = arith.maximumf %5, %6 : vector<16x128xf32>
    %c0_6 = arith.constant 0 : index
    %c0_7 = arith.constant 0 : index
    %8 = vector.load %arg4[%c0_6, %c0_7] : memref<128x128xf32, #tpu.memory_space<vmem>>, vector<128x128xf32>
    %cst_8 = arith.constant dense<0.000000e+00> : vector<16x128xf32>
    %9 = tpu.matmul %7, %8, %cst_8 {dimension_numbers = #tpu.dot_dimension_numbers<[1], [0], [0], [1], [0, 0, 1, 1], [], []>} : vector<16x128xf32>, vector<128x128xf32>, vector<16x128xf32> -> vector<16x128xf32>
    %c0_9 = arith.constant 0 : index
    %c0_10 = arith.constant 0 : index
    %10 = vector.load %arg5[%c0_9, %c0_10] : memref<1x128xf32, #tpu.memory_space<vmem>>, vector<1x128xf32>
    %11 = vector.broadcast %10 : vector<1x128xf32> to vector<16x128xf32>
    %12 = arith.addf %9, %11 : vector<16x128xf32>
    %cst_11 = arith.constant 0.000000e+00 : f32
    %13 = vector.broadcast %cst_11 : f32 to vector<16x128xf32>
    %14 = arith.maximumf %12, %13 : vector<16x128xf32>
    %c0_12 = arith.constant 0 : index
    %c0_13 = arith.constant 0 : index
    %15 = vector.load %arg6[%c0_12, %c0_13] : memref<128x128xf32, #tpu.memory_space<vmem>>, vector<128x128xf32>
    %cst_14 = arith.constant dense<0.000000e+00> : vector<16x128xf32>
    %16 = tpu.matmul %14, %15, %cst_14 {dimension_numbers = #tpu.dot_dimension_numbers<[1], [0], [0], [1], [0, 0, 1, 1], [], []>} : vector<16x128xf32>, vector<128x128xf32>, vector<16x128xf32> -> vector<16x128xf32>
    %c0_15 = arith.constant 0 : index
    %c0_16 = arith.constant 0 : index
    %17 = vector.load %arg7[%c0_15, %c0_16] : memref<1x128xf32, #tpu.memory_space<vmem>>, vector<1x128xf32>
    %18 = vector.broadcast %17 : vector<1x128xf32> to vector<16x128xf32>
    %19 = arith.addf %16, %18 : vector<16x128xf32>
    %20 = math.tanh %19 : vector<16x128xf32>
    %cst_17 = arith.constant 2.000000e+00 : f32
    %21 = vector.broadcast %cst_17 : f32 to vector<16x128xf32>
    %22 = arith.mulf %21, %20 : vector<16x128xf32>
    %c0_18 = arith.constant 0 : index
    %c0_19 = arith.constant 0 : index
    %23 = vector.load %arg8[%c0_18, %c0_19] : memref<16x128xf32, #tpu.memory_space<vmem>>, vector<16x128xf32>
    tpu.vector_store %arg8[%c0_18, %c0_19], %22 {strides = array<i32>} : memref<16x128xf32, #tpu.memory_space<vmem>>, vector<16x128xf32>,
    return
  }
  func.func @transform_0(%arg0: i32) -> (i32, i32) {
    %c0_i32 = arith.constant 0 : i32
    %c0_i32_0 = arith.constant 0 : i32
    return %arg0, %c0_i32 : i32, i32
  }
  func.func @transform_1(%arg0: i32) -> (i32, i32) {
    %c0_i32 = arith.constant 0 : i32
    %c0_i32_0 = arith.constant 0 : i32
    %c0_i32_1 = arith.constant 0 : i32
    return %c0_i32, %c0_i32_0 : i32, i32
  }
  func.func @transform_2(%arg0: i32) -> (i32, i32) {
    %c0_i32 = arith.constant 0 : i32
    %c0_i32_0 = arith.constant 0 : i32
    %c0_i32_1 = arith.constant 0 : i32
    return %c0_i32, %c0_i32_0 : i32, i32
  }
  func.func @transform_3(%arg0: i32) -> (i32, i32) {
    %c0_i32 = arith.constant 0 : i32
    %c0_i32_0 = arith.constant 0 : i32
    %c0_i32_1 = arith.constant 0 : i32
    return %c0_i32, %c0_i32_0 : i32, i32
  }
  func.func @transform_4(%arg0: i32) -> (i32, i32) {
    %c0_i32 = arith.constant 0 : i32
    %c0_i32_0 = arith.constant 0 : i32
    %c0_i32_1 = arith.constant 0 : i32
    return %c0_i32, %c0_i32_0 : i32, i32
  }
  func.func @transform_5(%arg0: i32) -> (i32, i32) {
    %c0_i32 = arith.constant 0 : i32
    %c0_i32_0 = arith.constant 0 : i32
    %c0_i32_1 = arith.constant 0 : i32
    return %c0_i32, %c0_i32_0 : i32, i32
  }
  func.func @transform_6(%arg0: i32) -> (i32, i32) {
    %c0_i32 = arith.constant 0 : i32
    %c0_i32_0 = arith.constant 0 : i32
    %c0_i32_1 = arith.constant 0 : i32
    return %c0_i32, %c0_i32_0 : i32, i32
  }
  func.func @transform_7(%arg0: i32) -> (i32, i32) {
    %c0_i32 = arith.constant 0 : i32
    %c0_i32_0 = arith.constant 0 : i32
    return %arg0, %c0_i32 : i32, i32
  }
}

</mosaic_0001>

<bundles_post_ra>
// kernel: tpu_custom_call.1
= control target key start
LH: loop header
LB: loop body
LE: loop exit
PB: predicated region body
PF: predicated region fallthrough
CT: control target
= control target key end

     0   :  { %12 = vsyncpa [#allocation3], 0  ;;  %s743_s0 = inlined_call_operand.vmem [shape: f32[16,8], index: 0, kind: input, shape index: {}]   ;;  %s744_s1 = inlined_call_operand.vmem [shape: f32[8,128], index: 1, kind: input, shape index: {}]   ;;  %s745_s2 = inlined_call_operand.vmem [shape: f32[1,128], index: 2, kind: input, shape index: {}]   ;;  %s746_s3 = inlined_call_operand.hbm [shape: f32[128,128], index: 3, kind: input, shape index: {}]   ;;  %s747_s4 = inlined_call_operand.vmem [shape: f32[1,128], index: 4, kind: input, shape index: {}]   ;;  %s748_s5 = inlined_call_operand.hbm [shape: f32[128,128], index: 5, kind: input, shape index: {}]   ;;  %s749_s6 = inlined_call_operand.vmem [shape: f32[1,128], index: 6, kind: input, shape index: {}]   ;;  %s750_s7 = inlined_call_operand.hbm [shape: f32[16,128], index: 7, kind: output, shape index: {}]  }
   0x1   :  { %13 = vsyncpa [#allocation6], 0 }
   0x2   :  { %14 = vsyncpa [#allocation4], 0  ;;  %s635_s24 = smov [#allocation2]   ;;  %s563_s28 = scalar_lea.hbm %s746_s3, 2048 }
   0x3   :  { %s26_s25 = sshll.u32 %s635_s24, 4  ;;  %p564_p0 = scmp.ne.s32.totalorder %s746_s3, %s563_s28  ;;  %s27_s25 = int_to_ptr.vmem [resolvable:$true] %s26_s25 }
   0x4   :  { %p567_p1 = scmp.lt.u32.totalorder %s563_s28, %s746_s3 }
   0x6   :  { %p569_p2 = pnand %p567_p1, %p564_p0 }
   0x8   :  { %572 = shalt.err (!%p569_p2)
}
   0x9   :  { %s573_s10 = scalar_lea.vmem %s27_s25, 2048  ;;  %p578_p4 = scmp.lt.s32.totalorder %s27_s25, %s27_s25 }
   0xa   :  { %p574_p3 = scmp.ne.s32.totalorder %s27_s25, %s573_s10  ;;  %p579_p5 = scmp.lt.s32.totalorder %s573_s10, %s573_s10 }
   0xc   :  { %p580_p6 = por %p579_p5, %p578_p4 }
   0xe   :  { %p581_p7 = pnand %p580_p6, %p574_p3 }
  0x10   :  { %584 = shalt.err (!%p581_p7)
}
  0x11   :  { %s636_s11 = smov 128   ;;  %s637_s12 = smov 8  }
  0x12   :  { %32 = dma.hbm_to_vmem [thread:$0]  %s746_s3, 2048, %s27_s25, [#allocation3], %s636_s11, %s636_s11, %s637_s12  }
  0x13   :  { %s638_s15 = smov [#allocation5]   ;;  %s585_s19 = scalar_lea.hbm %s748_s5, 2048 }
  0x14   :  { %s40_s16 = sshll.u32 %s638_s15, 4  ;;  %p586_p8 = scmp.ne.s32.totalorder %s748_s5, %s585_s19  ;;  %s41_s16 = int_to_ptr.vmem [resolvable:$true] %s40_s16 }
  0x15   :  { %p589_p9 = scmp.lt.u32.totalorder %s585_s19, %s748_s5 }
  0x17   :  { %p591_p10 = pnand %p589_p9, %p586_p8 }
  0x19   :  { %594 = shalt.err (!%p591_p10)
}
  0x1a   :  { %s595_s24 = scalar_lea.vmem %s41_s16, 2048  ;;  %p600_p12 = scmp.lt.s32.totalorder %s41_s16, %s41_s16 }
  0x1b   :  { %p596_p11 = scmp.ne.s32.totalorder %s41_s16, %s595_s24  ;;  %p601_p13 = scmp.lt.s32.totalorder %s595_s24, %s595_s24 }
  0x1d   :  { %p602_p0 = por %p601_p13, %p600_p12 }
  0x1f   :  { %p603_p1 = pnand %p602_p0, %p596_p11 }
  0x21   :  { %606 = shalt.err (!%p603_p1)
}
  0x22   :  { %46 = dma.hbm_to_vmem [thread:$0]  %s748_s5, 2048, %s41_s16, [#allocation6], %s636_s11, %s636_s11, %s637_s12  }
  0x23   :  { %629 = dma.done.wait [#allocation3], 2048  }
  0x24   :  { %630 = vsyncadd [#allocation3], 4294965248 }
  0x25   :  { %631 = dma.done.wait [#allocation6], 2048  }
  0x26   :  { %632 = vsyncadd [#allocation6], 4294965248  ;;  %vm65_vm0 = vcmask 64512   ;;  %v57_v0 = vld [vmem:[%s744_s1] sm:$0xff]  ;;  %v56_v2 = vld [vmem:[%s743_s0 + $0x8] sm:$0xff]  ;;  %s639_s13 = smov [#allocation7]  }
  0x27   :  { %v55_v1 = vld [vmem:[%s743_s0] sm:$0xff]  ;;  %415 = vmatprep.subr.mxu0 %v57_v0  ;;  %v150_v4 = vld [vmem:[#allocation2 + $0x8] sm:$0xff]  ;;  %v151_v5 = vld [vmem:[#allocation2 + $0x10] sm:$0xff] }
  0x28   :  { %417 = vmatprep.mubr.msk.f32.mxu0 %vm65_vm0, %v55_v1  ;;  %v149_v3 = vld [vmem:[#allocation2] sm:$0xff]  ;;  %416 = vmatpush3.msra.mxu0 %v57_v0  ;;  %v152_v7 = vld [vmem:[#allocation2 + $0x18] sm:$0xff]  ;;  %v154_v10 = vld [vmem:[#allocation2 + $0x28] sm:$0xff] }
  0x29   :  { %v490_v6 = vpack.c.bf16 %v150_v4, %v149_v3  ;;  %418 = vmatmul.mubr.msk.f32.vlgmr.msra.gmra.mrb[0].mxu0 %vm65_vm0, %v56_v2  ;;  %v494_v8 = vpack.c.bf16 %v152_v7, %v151_v5  ;;  %v153_v9 = vld [vmem:[#allocation2 + $0x20] sm:$0xff]  ;;  %v155_v12 = vld [vmem:[#allocation2 + $0x30] sm:$0xff]  ;;  %v156_v13 = vld [vmem:[#allocation2 + $0x38] sm:$0xff] }
  0x2a   :  { %v498_v11 = vpack.c.bf16 %v154_v10, %v153_v9  ;;  %v502_v14 = vpack.c.bf16 %v156_v13, %v155_v12  ;;  %v157_v15 = vld [vmem:[#allocation2 + $0x40] sm:$0xff]  ;;  %v158_v16 = vld [vmem:[#allocation2 + $0x48] sm:$0xff]  ;;  %v159_v18 = vld [vmem:[#allocation2 + $0x50] sm:$0xff] }
  0x2b   :  { %491 = vmatprep.subr.bf16.mxu1 %v490_v6  ;;  %v506_v17 = vpack.c.bf16 %v158_v16, %v157_v15  ;;  %v160_v19 = vld [vmem:[#allocation2 + $0x58] sm:$0xff]  ;;  %v161_v21 = vld [vmem:[#allocation2 + $0x60] sm:$0xff]  ;;  %v162_v22 = vld [vmem:[#allocation2 + $0x68] sm:$0xff] }
  0x2c   :  { %493 = vmatpush3.bf16.msra.mxu1 %v490_v6  ;;  %v510_v20 = vpack.c.bf16 %v160_v19, %v159_v18  ;;  %v514_v23 = vpack.c.bf16 %v162_v22, %v161_v21  ;;  %v163_v24 = vld [vmem:[#allocation2 + $0x70] sm:$0xff]  ;;  %v164_v25 = vld [vmem:[#allocation2 + $0x78] sm:$0xff]  ;;  %v249_v27 = vld [vmem:[#allocation5] sm:$0xff] }
  0x2d   :  { %495 = vmatprep.subr.bf16.mxu1 %v494_v8  ;;  %v518_v26 = vpack.c.bf16 %v164_v25, %v163_v24  ;;  %v250_v28 = vld [vmem:[#allocation5 + $0x8] sm:$0xff]  ;;  %v251_v29 = vld [vmem:[#allocation5 + $0x10] sm:$0xff]  ;;  %v252_v31 = vld [vmem:[#allocation5 + $0x18] sm:$0xff] }
  0x2e   :  { %v522_v30 = vpack.c.bf16 %v250_v28, %v249_v27  ;;  %v526_v32 = vpack.c.bf16 %v252_v31, %v251_v29  ;;  %v253_v33 = vld [vmem:[#allocation5 + $0x20] sm:$0xff]  ;;  %v254_v34 = vld [vmem:[#allocation5 + $0x28] sm:$0xff]  ;;  %v255_v36 = vld [vmem:[#allocation5 + $0x30] sm:$0xff] }
  0x2f   :  { %v530_v35 = vpack.c.bf16 %v254_v34, %v253_v33  ;;  %v256_v37 = vld [vmem:[#allocation5 + $0x38] sm:$0xff]  ;;  %v257_v39 = vld [vmem:[#allocation5 + $0x40] sm:$0xff]  ;;  %v258_v40 = vld [vmem:[#allocation5 + $0x48] sm:$0xff] }
  0x30   :  { %497 = vmatpush3.bf16.msra.mxu1 %v494_v8  ;;  %523 = vmatprep.subr.bf16.mxu0 %v522_v30  ;;  %v534_v38 = vpack.c.bf16 %v256_v37, %v255_v36  ;;  %v538_v41 = vpack.c.bf16 %v258_v40, %v257_v39  ;;  %v259_v42 = vld [vmem:[#allocation5 + $0x50] sm:$0xff]  ;;  %v260_v43 = vld [vmem:[#allocation5 + $0x58] sm:$0xff]  ;;  %v261_v45 = vld [vmem:[#allocation5 + $0x60] sm:$0xff] }
  0x31   :  { %499 = vmatprep.subr.bf16.mxu1 %v498_v11  ;;  %525 = vmatpush3.bf16.msra.mxu0 %v522_v30  ;;  %v542_v44 = vpack.c.bf16 %v260_v43, %v259_v42  ;;  %v262_v46 = vld [vmem:[#allocation5 + $0x68] sm:$0xff]  ;;  %v371_v48 = vld [vmem:[%s745_s2] ss:$0 sm:$0xff]  ;;  %v263_v55 = vld [vmem:[#allocation5 + $0x70] sm:$0xff] }
  0x32   :  { %527 = vmatprep.subr.bf16.mxu0 %v526_v32  ;;  %v546_v47 = vpack.c.bf16 %v262_v46, %v261_v45  ;;  %v264_v56 = vld [vmem:[#allocation5 + $0x78] sm:$0xff]  ;;  %v374_v58 = vld [vmem:[%s747_s4] ss:$0 sm:$0xff]  ;;  %s358_s4 = sshll.u32 %s639_s13, 4  ;;  %s359_s4 = int_to_ptr.vmem [resolvable:$true] %s358_s4 }
  0x33   :  { %v550_v57 = vpack.c.bf16 %v264_v56, %v263_v55  ;;  %v375_v1 = vld [vmem:[%s749_s6] ss:$0 sm:$0xff]  ;;  %s607_s14 = scalar_lea.vmem %s359_s4, 256  ;;  %p612_p3 = scmp.lt.s32.totalorder %s359_s4, %s359_s4 }
  0x34   :  { %501 = vmatpush3.bf16.msra.mxu1 %v498_v11  ;;  %p608_p2 = scmp.ne.s32.totalorder %s359_s4, %s607_s14  ;;  %p613_p4 = scmp.lt.s32.totalorder %s607_s14, %s607_s14 }
  0x35   :  { %503 = vmatprep.subr.bf16.mxu1 %v502_v14  ;;  %529 = vmatpush3.bf16.msra.mxu0 %v526_v32 }
  0x36   :  { %531 = vmatprep.subr.bf16.mxu0 %v530_v35  ;;  %p614_p5 = por %p613_p4, %p612_p3 }
  0x38   :  { %505 = vmatpush3.bf16.msra.mxu1 %v502_v14  ;;  %p615_p6 = pnand %p614_p5, %p608_p2 }
  0x39   :  { %507 = vmatprep.subr.bf16.mxu1 %v506_v17  ;;  %533 = vmatpush3.bf16.msra.mxu0 %v530_v35 }
  0x3a   :  { %535 = vmatprep.subr.bf16.mxu0 %v534_v38 }
  0x3c   :  { %509 = vmatpush3.bf16.msra.mxu1 %v506_v17 }
  0x3d   :  { %511 = vmatprep.subr.bf16.mxu1 %v510_v20  ;;  %537 = vmatpush3.bf16.msra.mxu0 %v534_v38 }
  0x3e   :  { %539 = vmatprep.subr.bf16.mxu0 %v538_v41 }
  0x40   :  { %513 = vmatpush3.bf16.msra.mxu1 %v510_v20 }
  0x41   :  { %515 = vmatprep.subr.bf16.mxu1 %v514_v23  ;;  %541 = vmatpush3.bf16.msra.mxu0 %v538_v41 }
  0x42   :  { %543 = vmatprep.subr.bf16.mxu0 %v542_v44 }
  0x44   :  { %517 = vmatpush3.bf16.msra.mxu1 %v514_v23 }
  0x45   :  { %519 = vmatprep.subr.bf16.mxu1 %v518_v26  ;;  %545 = vmatpush3.bf16.msra.mxu0 %v542_v44 }
  0x46   :  { %547 = vmatprep.subr.bf16.mxu0 %v546_v47 }
  0x48   :  { %521 = vmatpush3.bf16.msra.mxu1 %v518_v26 }
  0x49   :  { %549 = vmatpush3.bf16.msra.mxu0 %v546_v47 }
  0x4a   :  { %551 = vmatprep.subr.bf16.mxu0 %v550_v57 }
  0x4d   :  { %553 = vmatpush3.bf16.msra.mxu0 %v550_v57 }
  0xfc   :  { %v419_v49 = vpop.f32.mrb[0].mxu0 }
  0xfd   :  { %v144_v50 = vadd.f32 %v419_v49, %v371_v48  ;;  %v138_v51 = vpop.f32.mrb[1].mxu0 }
  0xfe   :  { %v139_v52 = vadd.f32 %v371_v48, %v138_v51 }
  0xff   :  { %v148_v54 = vmax.f32 %v144_v50, 0.0 }
 0x100   :  { %v147_v53 = vmax.f32 %v139_v52, 0.0 }
 0x102   :  { %452 = vmatprep.mubr.f32.mxu1 %v147_v53 }
 0x103   :  { %453 = vmatmul.mubr.f32.vlgmr.msra.gmra.mrb[0].mxu1 %v148_v54 }
 0x1d6   :  { %v454_v59 = vpop.f32.mrb[0].mxu1 }
 0x1d7   :  { %v244_v60 = vadd.f32 %v454_v59, %v374_v58  ;;  %v238_v61 = vpop.f32.mrb[1].mxu1 }
 0x1d8   :  { %v239_v62 = vadd.f32 %v374_v58, %v238_v61 }
 0x1d9   :  { %v248_v0 = vmax.f32 %v244_v60, 0.0 }
 0x1da   :  { %v247_v63 = vmax.f32 %v239_v62, 0.0 }
 0x1dc   :  { %487 = vmatprep.mubr.f32.mxu0 %v247_v63 }
 0x1dd   :  { %488 = vmatmul.mubr.f32.vlgmr.msra.gmra.mrb[2].mxu0 %v248_v0 }
 0x2b0   :  { %v489_v2 = vpop.f32.mrb[2].mxu0 }
 0x2b1   :  { %v344_v3 = vadd.f32 %v489_v2, %v375_v1  ;;  %v338_v4 = vpop.f32.mrb[3].mxu0 }
 0x2b2   :  { %v339_v5 = vadd.f32 %v375_v1, %v338_v4 }
 0x2b3   :  { %559 = vtanh.f32 %v344_v3 }
 0x2b4   :  { %561 = vtanh.f32 %v339_v5 }
 0x2bd   :  { %v560_v6 = vpop.eup %559 }
 0x2be   :  { %v562_v7 = vpop.eup %561  ;;  %v350_v8 = vmul.f32 2.0, %v560_v6 }
 0x2bf   :  { %v349_v9 = vmul.f32 2.0, %v562_v7 }
 0x2c0   :  { %352 = vst [vmem:[#allocation7 + $0x8] sm:$0xff] %v350_v8 }
 0x2c1   :  { %351 = vst [vmem:[#allocation7] sm:$0xff] %v349_v9 }
 0x2c2   :  { %618 = shalt.err (!%p615_p6)
}
 0x2c3   :  { %s619_s16 = scalar_lea.hbm %s750_s7, 256 }
 0x2c4   :  { %p620_p7 = scmp.ne.s32.totalorder %s750_s7, %s619_s16  ;;  %p623_p8 = scmp.lt.u32.totalorder %s619_s16, %s750_s7 }
 0x2c6   :  { %p625_p9 = pnand %p623_p8, %p620_p7 }
 0x2c8   :  { %628 = shalt.err (!%p625_p9)
}
 0x2c9   :  { %364 = dma.vmem_to_hbm [thread:$0]  %s359_s4, 256, %s750_s7, [#allocation4], %s636_s11, %s636_s11, %s637_s12  }
 0x2ca   :  { %633 = dma.done.wait [#allocation4], 256  }
 0x2cb   :  { %634 = vsyncadd [#allocation4], 4294967040 }
 0x2cc   :  { %368 = vsyncpa [#allocation3], 1 }
 0x2cd   :  { %369 = vsyncpa [#allocation6], 1 }
 0x2ce   :  { %370 = vsyncpa [#allocation4], 1 }

// kernel: tpu_custom_call.1
= control target key start
LH: loop header
LB: loop body
LE: loop exit
PB: predicated region body
PF: predicated region fallthrough
CT: control target
= control target key end

     0   :  { %12 = vsyncpa [#allocation3], 0  ;;  %s743_s0 = inlined_call_operand.vmem [shape: f32[16,8], index: 0, kind: input, shape index: {}]   ;;  %s744_s1 = inlined_call_operand.vmem [shape: f32[8,128], index: 1, kind: input, shape index: {}]   ;;  %s745_s2 = inlined_call_operand.vmem [shape: f32[1,128], index: 2, kind: input, shape index: {}]   ;;  %s746_s3 = inlined_call_operand.hbm [shape: f32[128,128], index: 3, kind: input, shape index: {}]   ;;  %s747_s4 = inlined_call_operand.vmem [shape: f32[1,128], index: 4, kind: input, shape index: {}]   ;;  %s748_s5 = inlined_call_operand.hbm [shape: f32[128,128], index: 5, kind: input, shape index: {}]   ;;  %s749_s6 = inlined_call_operand.vmem [shape: f32[1,128], index: 6, kind: input, shape index: {}]   ;;  %s750_s7 = inlined_call_operand.hbm [shape: f32[16,128], index: 7, kind: output, shape index: {}]  }
   0x1   :  { %13 = vsyncpa [#allocation6], 0 }
   0x2   :  { %14 = vsyncpa [#allocation4], 0  ;;  %s635_s24 = smov [#allocation2]   ;;  %s563_s28 = scalar_lea.hbm %s746_s3, 2048 }
   0x3   :  { %s26_s25 = sshll.u32 %s635_s24, 4  ;;  %p564_p0 = scmp.ne.s32.totalorder %s746_s3, %s563_s28  ;;  %s27_s25 = int_to_ptr.vmem [resolvable:$true] %s26_s25 }
   0x4   :  { %p567_p1 = scmp.lt.u32.totalorder %s563_s28, %s746_s3 }
   0x6   :  { %p569_p2 = pnand %p567_p1, %p564_p0 }
   0x8   :  { %572 = shalt.err (!%p569_p2)
}
   0x9   :  { %s573_s10 = scalar_lea.vmem %s27_s25, 2048  ;;  %p578_p4 = scmp.lt.s32.totalorder %s27_s25, %s27_s25 }
   0xa   :  { %p574_p3 = scmp.ne.s32.totalorder %s27_s25, %s573_s10  ;;  %p579_p5 = scmp.lt.s32.totalorder %s573_s10, %s573_s10 }
   0xc   :  { %p580_p6 = por %p579_p5, %p578_p4 }
   0xe   :  { %p581_p7 = pnand %p580_p6, %p574_p3 }
  0x10   :  { %584 = shalt.err (!%p581_p7)
}
  0x11   :  { %s636_s11 = smov 128   ;;  %s637_s12 = smov 8  }
  0x12   :  { %32 = dma.hbm_to_vmem [thread:$0]  %s746_s3, 2048, %s27_s25, [#allocation3], %s636_s11, %s636_s11, %s637_s12  }
  0x13   :  { %s638_s15 = smov [#allocation5]   ;;  %s585_s19 = scalar_lea.hbm %s748_s5, 2048 }
  0x14   :  { %s40_s16 = sshll.u32 %s638_s15, 4  ;;  %p586_p8 = scmp.ne.s32.totalorder %s748_s5, %s585_s19  ;;  %s41_s16 = int_to_ptr.vmem [resolvable:$true] %s40_s16 }
  0x15   :  { %p589_p9 = scmp.lt.u32.totalorder %s585_s19, %s748_s5 }
  0x17   :  { %p591_p10 = pnand %p589_p9, %p586_p8 }
  0x19   :  { %594 = shalt.err (!%p591_p10)
}
  0x1a   :  { %s595_s24 = scalar_lea.vmem %s41_s16, 2048  ;;  %p600_p12 = scmp.lt.s32.totalorder %s41_s16, %s41_s16 }
  0x1b   :  { %p596_p11 = scmp.ne.s32.totalorder %s41_s16, %s595_s24  ;;  %p601_p13 = scmp.lt.s32.totalorder %s595_s24, %s595_s24 }
  0x1d   :  { %p602_p0 = por %p601_p13, %p600_p12 }
  0x1f   :  { %p603_p1 = pnand %p602_p0, %p596_p11 }
  0x21   :  { %606 = shalt.err (!%p603_p1)
}
  0x22   :  { %46 = dma.hbm_to_vmem [thread:$0]  %s748_s5, 2048, %s41_s16, [#allocation6], %s636_s11, %s636_s11, %s637_s12  }
  0x23   :  { %629 = dma.done.wait [#allocation3], 2048  }
  0x24   :  { %630 = vsyncadd [#allocation3], 4294965248 }
  0x25   :  { %631 = dma.done.wait [#allocation6], 2048  }
  0x26   :  { %632 = vsyncadd [#allocation6], 4294965248  ;;  %vm65_vm0 = vcmask 64512   ;;  %v57_v0 = vld [vmem:[%s744_s1] sm:$0xff]  ;;  %v56_v2 = vld [vmem:[%s743_s0 + $0x8] sm:$0xff]  ;;  %s639_s13 = smov [#allocation7]  }
  0x27   :  { %v55_v1 = vld [vmem:[%s743_s0] sm:$0xff]  ;;  %415 = vmatprep.subr.mxu0 %v57_v0  ;;  %v150_v4 = vld [vmem:[#allocation2 + $0x8] sm:$0xff]  ;;  %v151_v5 = vld [vmem:[#allocation2 + $0x10] sm:$0xff] }
  0x28   :  { %417 = vmatprep.mubr.msk.f32.mxu0 %vm65_vm0, %v55_v1  ;;  %v149_v3 = vld [vmem:[#allocation2] sm:$0xff]  ;;  %416 = vmatpush3.msra.mxu0 %v57_v0  ;;  %v152_v7 = vld [vmem:[#allocation2 + $0x18] sm:$0xff]  ;;  %v154_v10 = vld [vmem:[#allocation2 + $0x28] sm:$0xff] }
  0x29   :  { %v490_v6 = vpack.c.bf16 %v150_v4, %v149_v3  ;;  %418 = vmatmul.mubr.msk.f32.vlgmr.msra.gmra.mrb[0].mxu0 %vm65_vm0, %v56_v2  ;;  %v494_v8 = vpack.c.bf16 %v152_v7, %v151_v5  ;;  %v153_v9 = vld [vmem:[#allocation2 + $0x20] sm:$0xff]  ;;  %v155_v12 = vld [vmem:[#allocation2 + $0x30] sm:$0xff]  ;;  %v156_v13 = vld [vmem:[#allocation2 + $0x38] sm:$0xff] }
  0x2a   :  { %v498_v11 = vpack.c.bf16 %v154_v10, %v153_v9  ;;  %v502_v14 = vpack.c.bf16 %v156_v13, %v155_v12  ;;  %v157_v15 = vld [vmem:[#allocation2 + $0x40] sm:$0xff]  ;;  %v158_v16 = vld [vmem:[#allocation2 + $0x48] sm:$0xff]  ;;  %v159_v18 = vld [vmem:[#allocation2 + $0x50] sm:$0xff] }
  0x2b   :  { %491 = vmatprep.subr.bf16.mxu1 %v490_v6  ;;  %v506_v17 = vpack.c.bf16 %v158_v16, %v157_v15  ;;  %v160_v19 = vld [vmem:[#allocation2 + $0x58] sm:$0xff]  ;;  %v161_v21 = vld [vmem:[#allocation2 + $0x60] sm:$0xff]  ;;  %v162_v22 = vld [vmem:[#allocation2 + $0x68] sm:$0xff] }
  0x2c   :  { %493 = vmatpush3.bf16.msra.mxu1 %v490_v6  ;;  %v510_v20 = vpack.c.bf16 %v160_v19, %v159_v18  ;;  %v514_v23 = vpack.c.bf16 %v162_v22, %v161_v21  ;;  %v163_v24 = vld [vmem:[#allocation2 + $0x70] sm:$0xff]  ;;  %v164_v25 = vld [vmem:[#allocation2 + $0x78] sm:$0xff]  ;;  %v249_v27 = vld [vmem:[#allocation5] sm:$0xff] }
  0x2d   :  { %495 = vmatprep.subr.bf16.mxu1 %v494_v8  ;;  %v518_v26 = vpack.c.bf16 %v164_v25, %v163_v24  ;;  %v250_v28 = vld [vmem:[#allocation5 + $0x8] sm:$0xff]  ;;  %v251_v29 = vld [vmem:[#allocation5 + $0x10] sm:$0xff]  ;;  %v252_v31 = vld [vmem:[#allocation5 + $0x18] sm:$0xff] }
  0x2e   :  { %v522_v30 = vpack.c.bf16 %v250_v28, %v249_v27  ;;  %v526_v32 = vpack.c.bf16 %v252_v31, %v251_v29  ;;  %v253_v33 = vld [vmem:[#allocation5 + $0x20] sm:$0xff]  ;;  %v254_v34 = vld [vmem:[#allocation5 + $0x28] sm:$0xff]  ;;  %v255_v36 = vld [vmem:[#allocation5 + $0x30] sm:$0xff] }
  0x2f   :  { %v530_v35 = vpack.c.bf16 %v254_v34, %v253_v33  ;;  %v256_v37 = vld [vmem:[#allocation5 + $0x38] sm:$0xff]  ;;  %v257_v39 = vld [vmem:[#allocation5 + $0x40] sm:$0xff]  ;;  %v258_v40 = vld [vmem:[#allocation5 + $0x48] sm:$0xff] }
  0x30   :  { %497 = vmatpush3.bf16.msra.mxu1 %v494_v8  ;;  %523 = vmatprep.subr.bf16.mxu0 %v522_v30  ;;  %v534_v38 = vpack.c.bf16 %v256_v37, %v255_v36  ;;  %v538_v41 = vpack.c.bf16 %v258_v40, %v257_v39  ;;  %v259_v42 = vld [vmem:[#allocation5 + $0x50] sm:$0xff]  ;;  %v260_v43 = vld [vmem:[#allocation5 + $0x58] sm:$0xff]  ;;  %v261_v45 = vld [vmem:[#allocation5 + $0x60] sm:$0xff] }
  0x31   :  { %499 = vmatprep.subr.bf16.mxu1 %v498_v11  ;;  %525 = vmatpush3.bf16.msra.mxu0 %v522_v30  ;;  %v542_v44 = vpack.c.bf16 %v260_v43, %v259_v42  ;;  %v262_v46 = vld [vmem:[#allocation5 + $0x68] sm:$0xff]  ;;  %v371_v48 = vld [vmem:[%s745_s2] ss:$0 sm:$0xff]  ;;  %v263_v55 = vld [vmem:[#allocation5 + $0x70] sm:$0xff] }
  0x32   :  { %527 = vmatprep.subr.bf16.mxu0 %v526_v32  ;;  %v546_v47 = vpack.c.bf16 %v262_v46, %v261_v45  ;;  %v264_v56 = vld [vmem:[#allocation5 + $0x78] sm:$0xff]  ;;  %v374_v58 = vld [vmem:[%s747_s4] ss:$0 sm:$0xff]  ;;  %s358_s4 = sshll.u32 %s639_s13, 4  ;;  %s359_s4 = int_to_ptr.vmem [resolvable:$true] %s358_s4 }
  0x33   :  { %v550_v57 = vpack.c.bf16 %v264_v56, %v263_v55  ;;  %v375_v1 = vld [vmem:[%s749_s6] ss:$0 sm:$0xff]  ;;  %s607_s14 = scalar_lea.vmem %s359_s4, 256  ;;  %p612_p3 = scmp.lt.s32.totalorder %s359_s4, %s359_s4 }
  0x34   :  { %501 = vmatpush3.bf16.msra.mxu1 %v498_v11  ;;  %p608_p2 = scmp.ne.s32.totalorder %s359_s4, %s607_s14  ;;  %p613_p4 = scmp.lt.s32.totalorder %s607_s14, %s607_s14 }
  0x35   :  { %503 = vmatprep.subr.bf16.mxu1 %v502_v14  ;;  %529 = vmatpush3.bf16.msra.mxu0 %v526_v32 }
  0x36   :  { %531 = vmatprep.subr.bf16.mxu0 %v530_v35  ;;  %p614_p5 = por %p613_p4, %p612_p3 }
  0x38   :  { %505 = vmatpush3.bf16.msra.mxu1 %v502_v14  ;;  %p615_p6 = pnand %p614_p5, %p608_p2 }
  0x39   :  { %507 = vmatprep.subr.bf16.mxu1 %v506_v17  ;;  %533 = vmatpush3.bf16.msra.mxu0 %v530_v35 }
  0x3a   :  { %535 = vmatprep.subr.bf16.mxu0 %v534_v38 }
  0x3c   :  { %509 = vmatpush3.bf16.msra.mxu1 %v506_v17 }
  0x3d   :  { %511 = vmatprep.subr.bf16.mxu1 %v510_v20  ;;  %537 = vmatpush3.bf16.msra.mxu0 %v534_v38 }
  0x3e   :  { %539 = vmatprep.subr.bf16.mxu0 %v538_v41 }
  0x40   :  { %513 = vmatpush3.bf16.msra.mxu1 %v510_v20 }
  0x41   :  { %515 = vmatprep.subr.bf16.mxu1 %v514_v23  ;;  %541 = vmatpush3.bf16.msra.mxu0 %v538_v41 }
  0x42   :  { %543 = vmatprep.subr.bf16.mxu0 %v542_v44 }
  0x44   :  { %517 = vmatpush3.bf16.msra.mxu1 %v514_v23 }
  0x45   :  { %519 = vmatprep.subr.bf16.mxu1 %v518_v26  ;;  %545 = vmatpush3.bf16.msra.mxu0 %v542_v44 }
  0x46   :  { %547 = vmatprep.subr.bf16.mxu0 %v546_v47 }
  0x48   :  { %521 = vmatpush3.bf16.msra.mxu1 %v518_v26 }
  0x49   :  { %549 = vmatpush3.bf16.msra.mxu0 %v546_v47 }
  0x4a   :  { %551 = vmatprep.subr.bf16.mxu0 %v550_v57 }
  0x4d   :  { %553 = vmatpush3.bf16.msra.mxu0 %v550_v57 }
  0xfc   :  { %v419_v49 = vpop.f32.mrb[0].mxu0 }
  0xfd   :  { %v144_v50 = vadd.f32 %v419_v49, %v371_v48  ;;  %v138_v51 = vpop.f32.mrb[1].mxu0 }
  0xfe   :  { %v139_v52 = vadd.f32 %v371_v48, %v138_v51 }
  0xff   :  { %v148_v54 = vmax.f32 %v144_v50, 0.0 }
 0x100   :  { %v147_v53 = vmax.f32 %v139_v52, 0.0 }
 0x102   :  { %452 = vmatprep.mubr.f32.mxu1 %v147_v53 }
 0x103   :  { %453 = vmatmul.mubr.f32.vlgmr.msra.gmra.mrb[0].mxu1 %v148_v54 }
 0x1d6   :  { %v454_v59 = vpop.f32.mrb[0].mxu1 }
 0x1d7   :  { %v244_v60 = vadd.f32 %v454_v59, %v374_v58  ;;  %v238_v61 = vpop.f32.mrb[1].mxu1 }
 0x1d8   :  { %v239_v62 = vadd.f32 %v374_v58, %v238_v61 }
 0x1d9   :  { %v248_v0 = vmax.f32 %v244_v60, 0.0 }
 0x1da   :  { %v247_v63 = vmax.f32 %v239_v62, 0.0 }
 0x1dc   :  { %487 = vmatprep.mubr.f32.mxu0 %v247_v63 }
 0x1dd   :  { %488 = vmatmul.mubr.f32.vlgmr.msra.gmra.mrb[2].mxu0 %v248_v0 }
 0x2b0   :  { %v489_v2 = vpop.f32.mrb[2].mxu0 }
 0x2b1   :  { %v344_v3 = vadd.f32 %v489_v2, %v375_v1  ;;  %v338_v4 = vpop.f32.mrb[3].mxu0 }
 0x2b2   :  { %v339_v5 = vadd.f32 %v375_v1, %v338_v4 }
 0x2b3   :  { %559 = vtanh.f32 %v344_v3 }
 0x2b4   :  { %561 = vtanh.f32 %v339_v5 }
 0x2bd   :  { %v560_v6 = vpop.eup %559 }
 0x2be   :  { %v562_v7 = vpop.eup %561  ;;  %v350_v8 = vmul.f32 2.0, %v560_v6 }
 0x2bf   :  { %v349_v9 = vmul.f32 2.0, %v562_v7 }
 0x2c0   :  { %352 = vst [vmem:[#allocation7 + $0x8] sm:$0xff] %v350_v8 }
 0x2c1   :  { %351 = vst [vmem:[#allocation7] sm:$0xff] %v349_v9 }
 0x2c2   :  { %618 = shalt.err (!%p615_p6)
}
 0x2c3   :  { %s619_s16 = scalar_lea.hbm %s750_s7, 256 }
 0x2c4   :  { %p620_p7 = scmp.ne.s32.totalorder %s750_s7, %s619_s16  ;;  %p623_p8 = scmp.lt.u32.totalorder %s619_s16, %s750_s7 }
 0x2c6   :  { %p625_p9 = pnand %p623_p8, %p620_p7 }
 0x2c8   :  { %628 = shalt.err (!%p625_p9)
}
 0x2c9   :  { %364 = dma.vmem_to_hbm [thread:$0]  %s359_s4, 256, %s750_s7, [#allocation4], %s636_s11, %s636_s11, %s637_s12  }
 0x2ca   :  { %633 = dma.done.wait [#allocation4], 256  }
 0x2cb   :  { %634 = vsyncadd [#allocation4], 4294967040 }
 0x2cc   :  { %368 = vsyncpa [#allocation3], 1 }
 0x2cd   :  { %369 = vsyncpa [#allocation6], 1 }
 0x2ce   :  { %370 = vsyncpa [#allocation4], 1 }

</bundles_post_ra>
